<compile_context>
chip_gen: v7x
topology: tpu7x:2x2x1
jax: 0.10.0
libtpu: 0.0.40
codegen_flags: <defaults>
</compile_context>

<pallas_src>
import math
import functools

import jax
import jax.numpy as jnp
from jax import lax
from jax.experimental import pallas as pl
from jax.experimental.pallas import tpu as pltpu


# ---------------------------------------------------------------------------
# Pallas kernel: single invocation, all heads processed in a static loop
# ---------------------------------------------------------------------------
def mha_kernel(x_ref, wq_ref, wk_ref, wv_ref, bq_ref, bk_ref, bv_ref,
               wo_ref, bo_ref, attn_ref, out_ref, *, num_heads):
    x = x_ref[...]                                               # [N, hidden]
    out = jnp.zeros(out_ref.shape, jnp.float32)                  # [N, Dout] acc

    # Static (unrolled) loop over heads: num_heads is small and compile-time
    # known; per-head weights are leading-axis slices (no lane shuffles).
    for h in range(num_heads):
        # Per-head projections; 1/sqrt(D) is pre-baked into wq/bq.
        q = jnp.dot(x, wq_ref[h], preferred_element_type=jnp.float32) + bq_ref[h]
        k = jnp.dot(x, wk_ref[h], preferred_element_type=jnp.float32) + bk_ref[h]
        v = jnp.dot(x, wv_ref[h], preferred_element_type=jnp.float32) + bv_ref[h]

        # Scores: contract the last dims directly (no K.T materialized).
        s = lax.dot_general(q, k, (((1,), (1,)), ((), ())),
                            preferred_element_type=jnp.float32)  # [N, N]

        # Numerically stable softmax.  Exact normalization: the attention
        # weights are returned to the caller, so rows must sum to exactly 1.
        s = s - jnp.max(s, axis=-1, keepdims=True)
        e = jnp.exp(s)
        p = e / jnp.sum(e, axis=-1, keepdims=True)

        attn_ref[h] = p                                          # [N, N]

        # Attended values + this head's block-column of Wo, accumulated in
        # registers; a single [N, Dout] store happens after the loop.
        pv = jnp.dot(p, v, preferred_element_type=jnp.float32)   # [N, D]
        out = out + jnp.dot(pv, wo_ref[h], preferred_element_type=jnp.float32)

    out_ref[...] = out + bo_ref[...]


# ---------------------------------------------------------------------------
# One-time parameter repack (do at init, NOT per forward call)
# Raw weights are stored as [in_features, out_features] (transpose of
# PyTorch nn.Linear), so y = x @ W + b.
# ---------------------------------------------------------------------------
def pack_params(params, *, num_heads, output_size):
    hidden = params["Wq"].shape[0]
    H, D = num_heads, output_size
    scale = 1.0 / math.sqrt(D)

    def head_major(w):                    # [hidden, H*D] -> [H, hidden, D]
        return jnp.transpose(w.reshape(hidden, H, D), (1, 0, 2))

    def head_major_bias(b):               # [1, H*D] -> [H, 1, D]
        return b.reshape(H, 1, D)

    return dict(
        wq=head_major(params["Wq"]) * scale,      # scale baked into Q
        bq=head_major_bias(params["bq"]) * scale,
        wk=head_major(params["Wk"]),
        bk=head_major_bias(params["bk"]),
        wv=head_major(params["Wv"]),
        bv=head_major_bias(params["bv"]),
        wo=params["Wo"].reshape(H, D, output_size),   # [H, D, Dout]
        bo=params["bo"],                              # [1, Dout]
    )


# ---------------------------------------------------------------------------
# Forward wrapper
# ---------------------------------------------------------------------------
def multi_head_attention(x, packed, *, num_heads, output_size):
    N, _ = x.shape
    H = num_heads

    vmem = pl.BlockSpec(memory_space=pltpu.MemorySpace.VMEM)   # whole-array VMEM
    kernel = functools.partial(mha_kernel, num_heads=H)

    attn, out = pl.pallas_call(
        kernel,
        out_shape=(
            jax.ShapeDtypeStruct((H, N, N), jnp.float32),        # attention weights
            jax.ShapeDtypeStruct((N, output_size), jnp.float32), # projected output
        ),
        in_specs=[vmem] * 9,
        out_specs=(vmem, vmem),
    )(x, packed["wq"], packed["wk"], packed["wv"],
      packed["bq"], packed["bk"], packed["bv"],
      packed["wo"], packed["bo"])
    return out, attn


# ---------------------------------------------------------------------------
# Deterministic parameter init (PyTorch nn.Linear style: U(-1/sqrt(fan_in), +))
# ---------------------------------------------------------------------------
def init_params(key, hidden_size, output_size, num_heads):
    hd = num_heads * output_size
    ks = jax.random.split(key, 8)

    def linear(kw, kb, fan_in, fan_out):
        bound = 1.0 / math.sqrt(fan_in)
        w = jax.random.uniform(kw, (fan_in, fan_out), jnp.float32, -bound, bound)
        b = jax.random.uniform(kb, (1, fan_out), jnp.float32, -bound, bound)
        return w, b

    Wq, bq = linear(ks[0], ks[1], hidden_size, hd)
    Wk, bk = linear(ks[2], ks[3], hidden_size, hd)
    Wv, bv = linear(ks[4], ks[5], hidden_size, hd)
    Wo, bo = linear(ks[6], ks[7], hd, output_size)
    return dict(Wq=Wq, bq=bq, Wk=Wk, bk=bk, Wv=Wv, bv=bv, Wo=Wo, bo=bo)


# ---------------------------------------------------------------------------
# Pure-JAX reference (mirrors the PyTorch forward exactly)
# ---------------------------------------------------------------------------
def reference(x, params, num_heads, output_size):
    N = x.shape[0]
    q = (x @ params["Wq"] + params["bq"]).reshape(N, num_heads, output_size).transpose(1, 0, 2)
    k = (x @ params["Wk"] + params["bk"]).reshape(N, num_heads, output_size).transpose(1, 0, 2)
    v = (x @ params["Wv"] + params["bv"]).reshape(N, num_heads, output_size).transpose(1, 0, 2)
    qk = jnp.einsum("hnd,hmd->hnm", q, k) / math.sqrt(output_size)
    attn = jax.nn.softmax(qk, axis=-1)
    av = jnp.einsum("hnm,hmd->hnd", attn, v).transpose(1, 0, 2).reshape(N, -1)
    out = av @ params["Wo"] + params["bo"]
    return out, attn


if __name__ == "__main__":
    N = 8              # number of graph nodes
    hidden_size = 32
    output_size = 16
    num_heads = 4

    key = jax.random.PRNGKey(0)
    kx, kp = jax.random.split(key)
    x = jax.random.normal(kx, (N, hidden_size), dtype=jnp.float32)

    params = init_params(kp, hidden_size, output_size, num_heads)
    # Pack once at init time (head-major layout + baked 1/sqrt(D) scale).
    packed = jax.tree_util.tree_map(
        jnp.asarray, pack_params(params, num_heads=num_heads, output_size=output_size))

    mha = jax.jit(functools.partial(multi_head_attention,
                                    num_heads=num_heads,
                                    output_size=output_size))
    out, attn = mha(x, packed)
    jax.block_until_ready((out, attn))

    out_ref, attn_ref = reference(x, params, num_heads, output_size)
    assert out.shape == (N, output_size)
    assert attn.shape == (num_heads, N, N)
    assert jnp.allclose(attn, attn_ref, atol=1e-5, rtol=1e-5), \
        float(jnp.max(jnp.abs(attn - attn_ref)))
    assert jnp.allclose(out, out_ref, atol=1e-4, rtol=1e-4), \
        float(jnp.max(jnp.abs(out - out_ref)))

    print("KERNEL_OK")
</pallas_src>

<mosaic_0001>
module attributes {stable_mosaic.version = 11 : i64} {
  func.func @mha_kernel(%arg0: memref<8x32xf32, #tpu.memory_space<vmem>>, %arg1: memref<4x32x16xf32, #tpu.memory_space<vmem>>, %arg2: memref<4x32x16xf32, #tpu.memory_space<vmem>>, %arg3: memref<4x32x16xf32, #tpu.memory_space<vmem>>, %arg4: memref<4x1x16xf32, #tpu.memory_space<vmem>>, %arg5: memref<4x1x16xf32, #tpu.memory_space<vmem>>, %arg6: memref<4x1x16xf32, #tpu.memory_space<vmem>>, %arg7: memref<4x16x16xf32, #tpu.memory_space<vmem>>, %arg8: memref<1x16xf32, #tpu.memory_space<vmem>>, %arg9: memref<4x8x8xf32, #tpu.memory_space<vmem>>, %arg10: memref<8x16xf32, #tpu.memory_space<vmem>>) attributes {dimension_semantics = [], scalar_prefetch = 0 : i64, scratch_operands = 0 : i64, tpu.core_type = #tpu.core_type<tc>} {
    %c0 = arith.constant 0 : index
    %c0_0 = arith.constant 0 : index
    %0 = vector.load %arg0[%c0, %c0_0] : memref<8x32xf32, #tpu.memory_space<vmem>>, vector<8x32xf32>
    %cst = arith.constant 0.000000e+00 : f32
    %1 = vector.broadcast %cst : f32 to vector<8x16xf32>
    %c0_1 = arith.constant 0 : index
    %c0_2 = arith.constant 0 : index
    %c0_3 = arith.constant 0 : index
    %2 = vector.load %arg1[%c0_1, %c0_2, %c0_3] : memref<4x32x16xf32, #tpu.memory_space<vmem>>, vector<1x32x16xf32>
    %3 = vector.shape_cast %2 : vector<1x32x16xf32> to vector<32x16xf32>
    %cst_4 = arith.constant dense<0.000000e+00> : vector<8x16xf32>
    %4 = tpu.matmul %0, %3, %cst_4 {dimension_numbers = #tpu.dot_dimension_numbers<[1], [0], [0], [1], [0, 0, 1, 1], [], []>} : vector<8x32xf32>, vector<32x16xf32>, vector<8x16xf32> -> vector<8x16xf32>
    %c0_5 = arith.constant 0 : index
    %c0_6 = arith.constant 0 : index
    %c0_7 = arith.constant 0 : index
    %5 = vector.load %arg4[%c0_5, %c0_6, %c0_7] : memref<4x1x16xf32, #tpu.memory_space<vmem>>, vector<1x1x16xf32>
    %6 = vector.shape_cast %5 : vector<1x1x16xf32> to vector<1x16xf32>
    %7 = vector.broadcast %6 : vector<1x16xf32> to vector<8x16xf32>
    %8 = arith.addf %4, %7 : vector<8x16xf32>
    %c0_8 = arith.constant 0 : index
    %c0_9 = arith.constant 0 : index
    %c0_10 = arith.constant 0 : index
    %9 = vector.load %arg2[%c0_8, %c0_9, %c0_10] : memref<4x32x16xf32, #tpu.memory_space<vmem>>, vector<1x32x16xf32>
    %10 = vector.shape_cast %9 : vector<1x32x16xf32> to vector<32x16xf32>
    %cst_11 = arith.constant dense<0.000000e+00> : vector<8x16xf32>
    %11 = tpu.matmul %0, %10, %cst_11 {dimension_numbers = #tpu.dot_dimension_numbers<[1], [0], [0], [1], [0, 0, 1, 1], [], []>} : vector<8x32xf32>, vector<32x16xf32>, vector<8x16xf32> -> vector<8x16xf32>
    %c0_12 = arith.constant 0 : index
    %c0_13 = arith.constant 0 : index
    %c0_14 = arith.constant 0 : index
    %12 = vector.load %arg5[%c0_12, %c0_13, %c0_14] : memref<4x1x16xf32, #tpu.memory_space<vmem>>, vector<1x1x16xf32>
    %13 = vector.shape_cast %12 : vector<1x1x16xf32> to vector<1x16xf32>
    %14 = vector.broadcast %13 : vector<1x16xf32> to vector<8x16xf32>
    %15 = arith.addf %11, %14 : vector<8x16xf32>
    %c0_15 = arith.constant 0 : index
    %c0_16 = arith.constant 0 : index
    %c0_17 = arith.constant 0 : index
    %16 = vector.load %arg3[%c0_15, %c0_16, %c0_17] : memref<4x32x16xf32, #tpu.memory_space<vmem>>, vector<1x32x16xf32>
    %17 = vector.shape_cast %16 : vector<1x32x16xf32> to vector<32x16xf32>
    %cst_18 = arith.constant dense<0.000000e+00> : vector<8x16xf32>
    %18 = tpu.matmul %0, %17, %cst_18 {dimension_numbers = #tpu.dot_dimension_numbers<[1], [0], [0], [1], [0, 0, 1, 1], [], []>} : vector<8x32xf32>, vector<32x16xf32>, vector<8x16xf32> -> vector<8x16xf32>
    %c0_19 = arith.constant 0 : index
    %c0_20 = arith.constant 0 : index
    %c0_21 = arith.constant 0 : index
    %19 = vector.load %arg6[%c0_19, %c0_20, %c0_21] : memref<4x1x16xf32, #tpu.memory_space<vmem>>, vector<1x1x16xf32>
    %20 = vector.shape_cast %19 : vector<1x1x16xf32> to vector<1x16xf32>
    %21 = vector.broadcast %20 : vector<1x16xf32> to vector<8x16xf32>
    %22 = arith.addf %18, %21 : vector<8x16xf32>
    %cst_22 = arith.constant dense<0.000000e+00> : vector<8x8xf32>
    %23 = tpu.matmul %8, %15, %cst_22 {dimension_numbers = #tpu.dot_dimension_numbers<[1], [1], [0], [0], [0, 0, 1, 0], [], []>} : vector<8x16xf32>, vector<8x16xf32>, vector<8x8xf32> -> vector<8x8xf32>
    %cst_23 = arith.constant dense<0xFF800000> : vector<8xf32>
    %24 = vector.multi_reduction <maximumf>, %23, %cst_23 [1] : vector<8x8xf32> to vector<8xf32>
    %25 = vector.shape_cast %24 : vector<8xf32> to vector<8x1xf32>
    %26 = vector.broadcast %25 : vector<8x1xf32> to vector<8x8xf32>
    %27 = arith.subf %23, %26 : vector<8x8xf32>
    %28 = math.exp %27 : vector<8x8xf32>
    %cst_24 = arith.constant dense<0.000000e+00> : vector<8xf32>
    %29 = vector.multi_reduction <add>, %28, %cst_24 [1] : vector<8x8xf32> to vector<8xf32>
    %30 = vector.shape_cast %29 : vector<8xf32> to vector<8x1xf32>
    %31 = vector.broadcast %30 : vector<8x1xf32> to vector<8x8xf32>
    %32 = arith.divf %28, %31 : vector<8x8xf32>
    %c0_25 = arith.constant 0 : index
    %c0_26 = arith.constant 0 : index
    %c0_27 = arith.constant 0 : index
    %33 = vector.load %arg9[%c0_25, %c0_26, %c0_27] : memref<4x8x8xf32, #tpu.memory_space<vmem>>, vector<1x8x8xf32>
    %34 = vector.shape_cast %33 : vector<1x8x8xf32> to vector<8x8xf32>
    %35 = vector.shape_cast %32 : vector<8x8xf32> to vector<1x8x8xf32>
    tpu.vector_store %arg9[%c0_25, %c0_26, %c0_27], %35 {strides = array<i32>} : memref<4x8x8xf32, #tpu.memory_space<vmem>>, vector<1x8x8xf32>,
    %cst_28 = arith.constant dense<0.000000e+00> : vector<8x16xf32>
    %36 = tpu.matmul %32, %22, %cst_28 {dimension_numbers = #tpu.dot_dimension_numbers<[1], [0], [0], [1], [0, 0, 1, 1], [], []>} : vector<8x8xf32>, vector<8x16xf32>, vector<8x16xf32> -> vector<8x16xf32>
    %c0_29 = arith.constant 0 : index
    %c0_30 = arith.constant 0 : index
    %c0_31 = arith.constant 0 : index
    %37 = vector.load %arg7[%c0_29, %c0_30, %c0_31] : memref<4x16x16xf32, #tpu.memory_space<vmem>>, vector<1x16x16xf32>
    %38 = vector.shape_cast %37 : vector<1x16x16xf32> to vector<16x16xf32>
    %cst_32 = arith.constant dense<0.000000e+00> : vector<8x16xf32>
    %39 = tpu.matmul %36, %38, %cst_32 {dimension_numbers = #tpu.dot_dimension_numbers<[1], [0], [0], [1], [0, 0, 1, 1], [], []>} : vector<8x16xf32>, vector<16x16xf32>, vector<8x16xf32> -> vector<8x16xf32>
    %40 = arith.addf %1, %39 : vector<8x16xf32>
    %c1 = arith.constant 1 : index
    %c0_33 = arith.constant 0 : index
    %c0_34 = arith.constant 0 : index
    %41 = vector.load %arg1[%c1, %c0_33, %c0_34] : memref<4x32x16xf32, #tpu.memory_space<vmem>>, vector<1x32x16xf32>
    %42 = vector.shape_cast %41 : vector<1x32x16xf32> to vector<32x16xf32>
    %cst_35 = arith.constant dense<0.000000e+00> : vector<8x16xf32>
    %43 = tpu.matmul %0, %42, %cst_35 {dimension_numbers = #tpu.dot_dimension_numbers<[1], [0], [0], [1], [0, 0, 1, 1], [], []>} : vector<8x32xf32>, vector<32x16xf32>, vector<8x16xf32> -> vector<8x16xf32>
    %c1_36 = arith.constant 1 : index
    %c0_37 = arith.constant 0 : index
    %c0_38 = arith.constant 0 : index
    %44 = vector.load %arg4[%c1_36, %c0_37, %c0_38] : memref<4x1x16xf32, #tpu.memory_space<vmem>>, vector<1x1x16xf32>
    %45 = vector.shape_cast %44 : vector<1x1x16xf32> to vector<1x16xf32>
    %46 = vector.broadcast %45 : vector<1x16xf32> to vector<8x16xf32>
    %47 = arith.addf %43, %46 : vector<8x16xf32>
    %c1_39 = arith.constant 1 : index
    %c0_40 = arith.constant 0 : index
    %c0_41 = arith.constant 0 : index
    %48 = vector.load %arg2[%c1_39, %c0_40, %c0_41] : memref<4x32x16xf32, #tpu.memory_space<vmem>>, vector<1x32x16xf32>
    %49 = vector.shape_cast %48 : vector<1x32x16xf32> to vector<32x16xf32>
    %cst_42 = arith.constant dense<0.000000e+00> : vector<8x16xf32>
    %50 = tpu.matmul %0, %49, %cst_42 {dimension_numbers = #tpu.dot_dimension_numbers<[1], [0], [0], [1], [0, 0, 1, 1], [], []>} : vector<8x32xf32>, vector<32x16xf32>, vector<8x16xf32> -> vector<8x16xf32>
    %c1_43 = arith.constant 1 : index
    %c0_44 = arith.constant 0 : index
    %c0_45 = arith.constant 0 : index
    %51 = vector.load %arg5[%c1_43, %c0_44, %c0_45] : memref<4x1x16xf32, #tpu.memory_space<vmem>>, vector<1x1x16xf32>
    %52 = vector.shape_cast %51 : vector<1x1x16xf32> to vector<1x16xf32>
    %53 = vector.broadcast %52 : vector<1x16xf32> to vector<8x16xf32>
    %54 = arith.addf %50, %53 : vector<8x16xf32>
    %c1_46 = arith.constant 1 : index
    %c0_47 = arith.constant 0 : index
    %c0_48 = arith.constant 0 : index
    %55 = vector.load %arg3[%c1_46, %c0_47, %c0_48] : memref<4x32x16xf32, #tpu.memory_space<vmem>>, vector<1x32x16xf32>
    %56 = vector.shape_cast %55 : vector<1x32x16xf32> to vector<32x16xf32>
    %cst_49 = arith.constant dense<0.000000e+00> : vector<8x16xf32>
    %57 = tpu.matmul %0, %56, %cst_49 {dimension_numbers = #tpu.dot_dimension_numbers<[1], [0], [0], [1], [0, 0, 1, 1], [], []>} : vector<8x32xf32>, vector<32x16xf32>, vector<8x16xf32> -> vector<8x16xf32>
    %c1_50 = arith.constant 1 : index
    %c0_51 = arith.constant 0 : index
    %c0_52 = arith.constant 0 : index
    %58 = vector.load %arg6[%c1_50, %c0_51, %c0_52] : memref<4x1x16xf32, #tpu.memory_space<vmem>>, vector<1x1x16xf32>
    %59 = vector.shape_cast %58 : vector<1x1x16xf32> to vector<1x16xf32>
    %60 = vector.broadcast %59 : vector<1x16xf32> to vector<8x16xf32>
    %61 = arith.addf %57, %60 : vector<8x16xf32>
    %cst_53 = arith.constant dense<0.000000e+00> : vector<8x8xf32>
    %62 = tpu.matmul %47, %54, %cst_53 {dimension_numbers = #tpu.dot_dimension_numbers<[1], [1], [0], [0], [0, 0, 1, 0], [], []>} : vector<8x16xf32>, vector<8x16xf32>, vector<8x8xf32> -> vector<8x8xf32>
    %cst_54 = arith.constant dense<0xFF800000> : vector<8xf32>
    %63 = vector.multi_reduction <maximumf>, %62, %cst_54 [1] : vector<8x8xf32> to vector<8xf32>
    %64 = vector.shape_cast %63 : vector<8xf32> to vector<8x1xf32>
    %65 = vector.broadcast %64 : vector<8x1xf32> to vector<8x8xf32>
    %66 = arith.subf %62, %65 : vector<8x8xf32>
    %67 = math.exp %66 : vector<8x8xf32>
    %cst_55 = arith.constant dense<0.000000e+00> : vector<8xf32>
    %68 = vector.multi_reduction <add>, %67, %cst_55 [1] : vector<8x8xf32> to vector<8xf32>
    %69 = vector.shape_cast %68 : vector<8xf32> to vector<8x1xf32>
    %70 = vector.broadcast %69 : vector<8x1xf32> to vector<8x8xf32>
    %71 = arith.divf %67, %70 : vector<8x8xf32>
    %c1_56 = arith.constant 1 : index
    %c0_57 = arith.constant 0 : index
    %c0_58 = arith.constant 0 : index
    %72 = vector.load %arg9[%c1_56, %c0_57, %c0_58] : memref<4x8x8xf32, #tpu.memory_space<vmem>>, vector<1x8x8xf32>
    %73 = vector.shape_cast %72 : vector<1x8x8xf32> to vector<8x8xf32>
    %74 = vector.shape_cast %71 : vector<8x8xf32> to vector<1x8x8xf32>
    tpu.vector_store %arg9[%c1_56, %c0_57, %c0_58], %74 {strides = array<i32>} : memref<4x8x8xf32, #tpu.memory_space<vmem>>, vector<1x8x8xf32>,
    %cst_59 = arith.constant dense<0.000000e+00> : vector<8x16xf32>
    %75 = tpu.matmul %71, %61, %cst_59 {dimension_numbers = #tpu.dot_dimension_numbers<[1], [0], [0], [1], [0, 0, 1, 1], [], []>} : vector<8x8xf32>, vector<8x16xf32>, vector<8x16xf32> -> vector<8x16xf32>
    %c1_60 = arith.constant 1 : index
    %c0_61 = arith.constant 0 : index
    %c0_62 = arith.constant 0 : index
    %76 = vector.load %arg7[%c1_60, %c0_61, %c0_62] : memref<4x16x16xf32, #tpu.memory_space<vmem>>, vector<1x16x16xf32>
    %77 = vector.shape_cast %76 : vector<1x16x16xf32> to vector<16x16xf32>
    %cst_63 = arith.constant dense<0.000000e+00> : vector<8x16xf32>
    %78 = tpu.matmul %75, %77, %cst_63 {dimension_numbers = #tpu.dot_dimension_numbers<[1], [0], [0], [1], [0, 0, 1, 1], [], []>} : vector<8x16xf32>, vector<16x16xf32>, vector<8x16xf32> -> vector<8x16xf32>
    %79 = arith.addf %40, %78 : vector<8x16xf32>
    %c2 = arith.constant 2 : index
    %c0_64 = arith.constant 0 : index
    %c0_65 = arith.constant 0 : index
    %80 = vector.load %arg1[%c2, %c0_64, %c0_65] : memref<4x32x16xf32, #tpu.memory_space<vmem>>, vector<1x32x16xf32>
    %81 = vector.shape_cast %80 : vector<1x32x16xf32> to vector<32x16xf32>
    %cst_66 = arith.constant dense<0.000000e+00> : vector<8x16xf32>
    %82 = tpu.matmul %0, %81, %cst_66 {dimension_numbers = #tpu.dot_dimension_numbers<[1], [0], [0], [1], [0, 0, 1, 1], [], []>} : vector<8x32xf32>, vector<32x16xf32>, vector<8x16xf32> -> vector<8x16xf32>
    %c2_67 = arith.constant 2 : index
    %c0_68 = arith.constant 0 : index
    %c0_69 = arith.constant 0 : index
    %83 = vector.load %arg4[%c2_67, %c0_68, %c0_69] : memref<4x1x16xf32, #tpu.memory_space<vmem>>, vector<1x1x16xf32>
    %84 = vector.shape_cast %83 : vector<1x1x16xf32> to vector<1x16xf32>
    %85 = vector.broadcast %84 : vector<1x16xf32> to vector<8x16xf32>
    %86 = arith.addf %82, %85 : vector<8x16xf32>
    %c2_70 = arith.constant 2 : index
    %c0_71 = arith.constant 0 : index
    %c0_72 = arith.constant 0 : index
    %87 = vector.load %arg2[%c2_70, %c0_71, %c0_72] : memref<4x32x16xf32, #tpu.memory_space<vmem>>, vector<1x32x16xf32>
    %88 = vector.shape_cast %87 : vector<1x32x16xf32> to vector<32x16xf32>
    %cst_73 = arith.constant dense<0.000000e+00> : vector<8x16xf32>
    %89 = tpu.matmul %0, %88, %cst_73 {dimension_numbers = #tpu.dot_dimension_numbers<[1], [0], [0], [1], [0, 0, 1, 1], [], []>} : vector<8x32xf32>, vector<32x16xf32>, vector<8x16xf32> -> vector<8x16xf32>
    %c2_74 = arith.constant 2 : index
    %c0_75 = arith.constant 0 : index
    %c0_76 = arith.constant 0 : index
    %90 = vector.load %arg5[%c2_74, %c0_75, %c0_76] : memref<4x1x16xf32, #tpu.memory_space<vmem>>, vector<1x1x16xf32>
    %91 = vector.shape_cast %90 : vector<1x1x16xf32> to vector<1x16xf32>
    %92 = vector.broadcast %91 : vector<1x16xf32> to vector<8x16xf32>
    %93 = arith.addf %89, %92 : vector<8x16xf32>
    %c2_77 = arith.constant 2 : index
    %c0_78 = arith.constant 0 : index
    %c0_79 = arith.constant 0 : index
    %94 = vector.load %arg3[%c2_77, %c0_78, %c0_79] : memref<4x32x16xf32, #tpu.memory_space<vmem>>, vector<1x32x16xf32>
    %95 = vector.shape_cast %94 : vector<1x32x16xf32> to vector<32x16xf32>
    %cst_80 = arith.constant dense<0.000000e+00> : vector<8x16xf32>
    %96 = tpu.matmul %0, %95, %cst_80 {dimension_numbers = #tpu.dot_dimension_numbers<[1], [0], [0], [1], [0, 0, 1, 1], [], []>} : vector<8x32xf32>, vector<32x16xf32>, vector<8x16xf32> -> vector<8x16xf32>
    %c2_81 = arith.constant 2 : index
    %c0_82 = arith.constant 0 : index
    %c0_83 = arith.constant 0 : index
    %97 = vector.load %arg6[%c2_81, %c0_82, %c0_83] : memref<4x1x16xf32, #tpu.memory_space<vmem>>, vector<1x1x16xf32>
    %98 = vector.shape_cast %97 : vector<1x1x16xf32> to vector<1x16xf32>
    %99 = vector.broadcast %98 : vector<1x16xf32> to vector<8x16xf32>
    %100 = arith.addf %96, %99 : vector<8x16xf32>
    %cst_84 = arith.constant dense<0.000000e+00> : vector<8x8xf32>
    %101 = tpu.matmul %86, %93, %cst_84 {dimension_numbers = #tpu.dot_dimension_numbers<[1], [1], [0], [0], [0, 0, 1, 0], [], []>} : vector<8x16xf32>, vector<8x16xf32>, vector<8x8xf32> -> vector<8x8xf32>
    %cst_85 = arith.constant dense<0xFF800000> : vector<8xf32>
    %102 = vector.multi_reduction <maximumf>, %101, %cst_85 [1] : vector<8x8xf32> to vector<8xf32>
    %103 = vector.shape_cast %102 : vector<8xf32> to vector<8x1xf32>
    %104 = vector.broadcast %103 : vector<8x1xf32> to vector<8x8xf32>
    %105 = arith.subf %101, %104 : vector<8x8xf32>
    %106 = math.exp %105 : vector<8x8xf32>
    %cst_86 = arith.constant dense<0.000000e+00> : vector<8xf32>
    %107 = vector.multi_reduction <add>, %106, %cst_86 [1] : vector<8x8xf32> to vector<8xf32>
    %108 = vector.shape_cast %107 : vector<8xf32> to vector<8x1xf32>
    %109 = vector.broadcast %108 : vector<8x1xf32> to vector<8x8xf32>
    %110 = arith.divf %106, %109 : vector<8x8xf32>
    %c2_87 = arith.constant 2 : index
    %c0_88 = arith.constant 0 : index
    %c0_89 = arith.constant 0 : index
    %111 = vector.load %arg9[%c2_87, %c0_88, %c0_89] : memref<4x8x8xf32, #tpu.memory_space<vmem>>, vector<1x8x8xf32>
    %112 = vector.shape_cast %111 : vector<1x8x8xf32> to vector<8x8xf32>
    %113 = vector.shape_cast %110 : vector<8x8xf32> to vector<1x8x8xf32>
    tpu.vector_store %arg9[%c2_87, %c0_88, %c0_89], %113 {strides = array<i32>} : memref<4x8x8xf32, #tpu.memory_space<vmem>>, vector<1x8x8xf32>,
    %cst_90 = arith.constant dense<0.000000e+00> : vector<8x16xf32>
    %114 = tpu.matmul %110, %100, %cst_90 {dimension_numbers = #tpu.dot_dimension_numbers<[1], [0], [0], [1], [0, 0, 1, 1], [], []>} : vector<8x8xf32>, vector<8x16xf32>, vector<8x16xf32> -> vector<8x16xf32>
    %c2_91 = arith.constant 2 : index
    %c0_92 = arith.constant 0 : index
    %c0_93 = arith.constant 0 : index
    %115 = vector.load %arg7[%c2_91, %c0_92, %c0_93] : memref<4x16x16xf32, #tpu.memory_space<vmem>>, vector<1x16x16xf32>
    %116 = vector.shape_cast %115 : vector<1x16x16xf32> to vector<16x16xf32>
    %cst_94 = arith.constant dense<0.000000e+00> : vector<8x16xf32>
    %117 = tpu.matmul %114, %116, %cst_94 {dimension_numbers = #tpu.dot_dimension_numbers<[1], [0], [0], [1], [0, 0, 1, 1], [], []>} : vector<8x16xf32>, vector<16x16xf32>, vector<8x16xf32> -> vector<8x16xf32>
    %118 = arith.addf %79, %117 : vector<8x16xf32>
    %c3 = arith.constant 3 : index
    %c0_95 = arith.constant 0 : index
    %c0_96 = arith.constant 0 : index
    %119 = vector.load %arg1[%c3, %c0_95, %c0_96] : memref<4x32x16xf32, #tpu.memory_space<vmem>>, vector<1x32x16xf32>
    %120 = vector.shape_cast %119 : vector<1x32x16xf32> to vector<32x16xf32>
    %cst_97 = arith.constant dense<0.000000e+00> : vector<8x16xf32>
    %121 = tpu.matmul %0, %120, %cst_97 {dimension_numbers = #tpu.dot_dimension_numbers<[1], [0], [0], [1], [0, 0, 1, 1], [], []>} : vector<8x32xf32>, vector<32x16xf32>, vector<8x16xf32> -> vector<8x16xf32>
    %c3_98 = arith.constant 3 : index
    %c0_99 = arith.constant 0 : index
    %c0_100 = arith.constant 0 : index
    %122 = vector.load %arg4[%c3_98, %c0_99, %c0_100] : memref<4x1x16xf32, #tpu.memory_space<vmem>>, vector<1x1x16xf32>
    %123 = vector.shape_cast %122 : vector<1x1x16xf32> to vector<1x16xf32>
    %124 = vector.broadcast %123 : vector<1x16xf32> to vector<8x16xf32>
    %125 = arith.addf %121, %124 : vector<8x16xf32>
    %c3_101 = arith.constant 3 : index
    %c0_102 = arith.constant 0 : index
    %c0_103 = arith.constant 0 : index
    %126 = vector.load %arg2[%c3_101, %c0_102, %c0_103] : memref<4x32x16xf32, #tpu.memory_space<vmem>>, vector<1x32x16xf32>
    %127 = vector.shape_cast %126 : vector<1x32x16xf32> to vector<32x16xf32>
    %cst_104 = arith.constant dense<0.000000e+00> : vector<8x16xf32>
    %128 = tpu.matmul %0, %127, %cst_104 {dimension_numbers = #tpu.dot_dimension_numbers<[1], [0], [0], [1], [0, 0, 1, 1], [], []>} : vector<8x32xf32>, vector<32x16xf32>, vector<8x16xf32> -> vector<8x16xf32>
    %c3_105 = arith.constant 3 : index
    %c0_106 = arith.constant 0 : index
    %c0_107 = arith.constant 0 : index
    %129 = vector.load %arg5[%c3_105, %c0_106, %c0_107] : memref<4x1x16xf32, #tpu.memory_space<vmem>>, vector<1x1x16xf32>
    %130 = vector.shape_cast %129 : vector<1x1x16xf32> to vector<1x16xf32>
    %131 = vector.broadcast %130 : vector<1x16xf32> to vector<8x16xf32>
    %132 = arith.addf %128, %131 : vector<8x16xf32>
    %c3_108 = arith.constant 3 : index
    %c0_109 = arith.constant 0 : index
    %c0_110 = arith.constant 0 : index
    %133 = vector.load %arg3[%c3_108, %c0_109, %c0_110] : memref<4x32x16xf32, #tpu.memory_space<vmem>>, vector<1x32x16xf32>
    %134 = vector.shape_cast %133 : vector<1x32x16xf32> to vector<32x16xf32>
    %cst_111 = arith.constant dense<0.000000e+00> : vector<8x16xf32>
    %135 = tpu.matmul %0, %134, %cst_111 {dimension_numbers = #tpu.dot_dimension_numbers<[1], [0], [0], [1], [0, 0, 1, 1], [], []>} : vector<8x32xf32>, vector<32x16xf32>, vector<8x16xf32> -> vector<8x16xf32>
    %c3_112 = arith.constant 3 : index
    %c0_113 = arith.constant 0 : index
    %c0_114 = arith.constant 0 : index
    %136 = vector.load %arg6[%c3_112, %c0_113, %c0_114] : memref<4x1x16xf32, #tpu.memory_space<vmem>>, vector<1x1x16xf32>
    %137 = vector.shape_cast %136 : vector<1x1x16xf32> to vector<1x16xf32>
    %138 = vector.broadcast %137 : vector<1x16xf32> to vector<8x16xf32>
    %139 = arith.addf %135, %138 : vector<8x16xf32>
    %cst_115 = arith.constant dense<0.000000e+00> : vector<8x8xf32>
    %140 = tpu.matmul %125, %132, %cst_115 {dimension_numbers = #tpu.dot_dimension_numbers<[1], [1], [0], [0], [0, 0, 1, 0], [], []>} : vector<8x16xf32>, vector<8x16xf32>, vector<8x8xf32> -> vector<8x8xf32>
    %cst_116 = arith.constant dense<0xFF800000> : vector<8xf32>
    %141 = vector.multi_reduction <maximumf>, %140, %cst_116 [1] : vector<8x8xf32> to vector<8xf32>
    %142 = vector.shape_cast %141 : vector<8xf32> to vector<8x1xf32>
    %143 = vector.broadcast %142 : vector<8x1xf32> to vector<8x8xf32>
    %144 = arith.subf %140, %143 : vector<8x8xf32>
    %145 = math.exp %144 : vector<8x8xf32>
    %cst_117 = arith.constant dense<0.000000e+00> : vector<8xf32>
    %146 = vector.multi_reduction <add>, %145, %cst_117 [1] : vector<8x8xf32> to vector<8xf32>
    %147 = vector.shape_cast %146 : vector<8xf32> to vector<8x1xf32>
    %148 = vector.broadcast %147 : vector<8x1xf32> to vector<8x8xf32>
    %149 = arith.divf %145, %148 : vector<8x8xf32>
    %c3_118 = arith.constant 3 : index
    %c0_119 = arith.constant 0 : index
    %c0_120 = arith.constant 0 : index
    %150 = vector.load %arg9[%c3_118, %c0_119, %c0_120] : memref<4x8x8xf32, #tpu.memory_space<vmem>>, vector<1x8x8xf32>
    %151 = vector.shape_cast %150 : vector<1x8x8xf32> to vector<8x8xf32>
    %152 = vector.shape_cast %149 : vector<8x8xf32> to vector<1x8x8xf32>
    tpu.vector_store %arg9[%c3_118, %c0_119, %c0_120], %152 {strides = array<i32>} : memref<4x8x8xf32, #tpu.memory_space<vmem>>, vector<1x8x8xf32>,
    %cst_121 = arith.constant dense<0.000000e+00> : vector<8x16xf32>
    %153 = tpu.matmul %149, %139, %cst_121 {dimension_numbers = #tpu.dot_dimension_numbers<[1], [0], [0], [1], [0, 0, 1, 1], [], []>} : vector<8x8xf32>, vector<8x16xf32>, vector<8x16xf32> -> vector<8x16xf32>
    %c3_122 = arith.constant 3 : index
    %c0_123 = arith.constant 0 : index
    %c0_124 = arith.constant 0 : index
    %154 = vector.load %arg7[%c3_122, %c0_123, %c0_124] : memref<4x16x16xf32, #tpu.memory_space<vmem>>, vector<1x16x16xf32>
    %155 = vector.shape_cast %154 : vector<1x16x16xf32> to vector<16x16xf32>
    %cst_125 = arith.constant dense<0.000000e+00> : vector<8x16xf32>
    %156 = tpu.matmul %153, %155, %cst_125 {dimension_numbers = #tpu.dot_dimension_numbers<[1], [0], [0], [1], [0, 0, 1, 1], [], []>} : vector<8x16xf32>, vector<16x16xf32>, vector<8x16xf32> -> vector<8x16xf32>
    %157 = arith.addf %118, %156 : vector<8x16xf32>
    %c0_126 = arith.constant 0 : index
    %c0_127 = arith.constant 0 : index
    %158 = vector.load %arg8[%c0_126, %c0_127] : memref<1x16xf32, #tpu.memory_space<vmem>>, vector<1x16xf32>
    %159 = vector.broadcast %158 : vector<1x16xf32> to vector<8x16xf32>
    %160 = arith.addf %157, %159 : vector<8x16xf32>
    %c0_128 = arith.constant 0 : index
    %c0_129 = arith.constant 0 : index
    %161 = vector.load %arg10[%c0_128, %c0_129] : memref<8x16xf32, #tpu.memory_space<vmem>>, vector<8x16xf32>
    tpu.vector_store %arg10[%c0_128, %c0_129], %160 {strides = array<i32>} : memref<8x16xf32, #tpu.memory_space<vmem>>, vector<8x16xf32>,
    return
  }
}

</mosaic_0001>

<bundles_post_ra>
// kernel: multi_head_attention.1
= control target key start
LH: loop header
LB: loop body
LE: loop exit
PB: predicated region body
PF: predicated region fallthrough
CT: control target
= control target key end

     0   :  { %16 = vsyncpa [#allocation3], 0  ;;  %v2559_v3 = vmov 0.0|0.0   ;;  %vm2560_vm0 = vmmov 0   ;;  %v2561_v11 = vmov 0.0   ;;  %s3000_s0 = inlined_call_operand.vmem [shape: f32[8,32], index: 0, kind: input, shape index: {}]   ;;  %s3001_s1 = inlined_call_operand.vmem [shape: f32[4,32,16], index: 1, kind: input, shape index: {}]   ;;  %s3002_s2 = inlined_call_operand.vmem [shape: f32[4,32,16], index: 2, kind: input, shape index: {}]   ;;  %s3003_s3 = inlined_call_operand.vmem [shape: f32[4,32,16], index: 3, kind: input, shape index: {}]   ;;  %s3004_s4 = inlined_call_operand.vmem [shape: f32[4,1,16], index: 4, kind: input, shape index: {}]   ;;  %s3005_s5 = inlined_call_operand.vmem [shape: f32[4,1,16], index: 5, kind: input, shape index: {}]   ;;  %s3006_s6 = inlined_call_operand.vmem [shape: f32[4,1,16], index: 6, kind: input, shape index: {}]   ;;  %s3007_s7 = inlined_call_operand.vmem [shape: f32[4,16,16], index: 7, kind: input, shape index: {}]   ;;  %s3008_s8 = inlined_call_operand.vmem [shape: f32[1,16], index: 8, kind: input, shape index: {}]   ;;  %s3009_s9 = inlined_call_operand.hbm [shape: f32[4,8,8], index: 9, kind: output, shape index: {0}]   ;;  %s3010_s10 = inlined_call_operand.hbm [shape: f32[8,16], index: 10, kind: output, shape index: {1}]  }
   0x1   :  { %v122_v0 = vld [vmem:[%s3002_s2] sm:$0xff]  ;;  %v123_v1 = vld [vmem:[%s3002_s2 + $0x8] sm:$0xff]  ;;  %2410 = vmatprep.subr.bf16.mxu1 %v2559_v3  ;;  %2404 = vmatprep.subr.bf16.mxu0 %v2559_v3  ;;  %v124_v6 = vld [vmem:[%s3002_s2 + $0x10] sm:$0xff] }
   0x2   :  { %v37_v2 = vld [vmem:[%s3001_s1] sm:$0xff]  ;;  %v2411_v4 = vpack.c.bf16 %v123_v1, %v122_v0  ;;  %v38_v5 = vld [vmem:[%s3001_s1 + $0x8] sm:$0xff]  ;;  %v125_v7 = vld [vmem:[%s3002_s2 + $0x18] sm:$0xff]  ;;  %2223 = vmatprep.mubr.msk.f32.mxu1 %vm2560_vm0, %v2561_v11  ;;  %2212 = vmatprep.mubr.msk.f32.mxu0 %vm2560_vm0, %v2561_v11 }
   0x3   :  { %v2405_v8 = vpack.c.bf16 %v38_v5, %v37_v2  ;;  %v39_v9 = vld [vmem:[%s3001_s1 + $0x10] sm:$0xff]  ;;  %v40_v10 = vld [vmem:[%s3001_s1 + $0x18] sm:$0xff]  ;;  %v2414_v12 = vpack.c.bf16 %v125_v7, %v124_v6 }
   0x4   :  { %2412 = vmatpush3.bf16.msra.mxu1 %v2411_v4 }
   0x5   :  { %17 = vsyncpa [#allocation5], 0  ;;  %2406 = vmatpush3.bf16.msra.mxu0 %v2405_v8  ;;  %2413 = vmatprep.subr.bf16.mxu1 %v2559_v3  ;;  %v2408_v13 = vpack.c.bf16 %v40_v10, %v39_v9  ;;  %v2656_v14 = vld [vmem:[%s3000_s0] sm:$0xff]  ;;  %vm48_vm1 = vcmask 261120   ;;  %vm284_vm2 = vcmask 130048   ;;  %v204_v24 = vld [vmem:[%s3003_s3 + $0x8] sm:$0xff] }
   0x6   :  { %2407 = vmatprep.subr.bf16.mxu0 %v2559_v3  ;;  %v2026_v15 = vld [vmem:[%s3005_s5] ss:$0 sm:$0xff]  ;;  %v205_v25 = vld [vmem:[%s3003_s3 + $0x10] sm:$0xff]  ;;  %v206_v27 = vld [vmem:[%s3003_s3 + $0x18] sm:$0xff]  ;;  %vm361_vm3 = vcmask 64512  }
   0x7   :  { %v2024_v16 = vld [vmem:[%s3004_s4] ss:$0 sm:$0xff]  ;;  %v2420_v28 = vpack.c.bf16 %v206_v27, %v205_v25  ;;  %v2034_v42 = vld [vmem:[%s3001_s1 + $0x28] sm:$0xff]  ;;  %v2035_v44 = vld [vmem:[%s3001_s1 + $0x30] sm:$0xff] }
   0x8   :  { %2415 = vmatpush3.bf16.msra.mxu1 %v2414_v12  ;;  %v203_v23 = vld [vmem:[%s3003_s3] sm:$0xff]  ;;  %v2036_v45 = vld [vmem:[%s3001_s1 + $0x38] sm:$0xff]  ;;  %v2041_v49 = vld [vmem:[%s3002_s2 + $0x28] sm:$0xff] }
   0x9   :  { %2409 = vmatpush3.bf16.msra.mxu0 %v2408_v13  ;;  %2237 = vmatprep.subr.mxu1 %v2561_v11  ;;  %v2417_v26 = vpack.c.bf16 %v204_v24, %v203_v23  ;;  %v2028_v38 = vld [vmem:[%s3006_s6] ss:$0 sm:$0xff]  ;;  %v2426_v46 = vpack.c.bf16 %v2036_v45, %v2035_v44  ;;  %v2042_v53 = vld [vmem:[%s3002_s2 + $0x30] sm:$0xff]  ;;  %v2043_v54 = vld [vmem:[%s3002_s2 + $0x38] sm:$0xff] }
   0xa   :  { %2416 = vmatprep.subr.bf16.mxu0 %v2559_v3  ;;  %v2033_v41 = vld [vmem:[%s3001_s1 + $0x20] sm:$0xff]  ;;  %v2432_v55 = vpack.c.bf16 %v2043_v54, %v2042_v53  ;;  %v2048_v4 = vld [vmem:[%s3003_s3 + $0x28] sm:$0xff]  ;;  %v2049_v5 = vld [vmem:[%s3003_s3 + $0x30] sm:$0xff] }
   0xb   :  { %2224 = vmatmul.mubr.msk.f32.vlgmr.msra.gmra.mrb[0].mxu1 %vm48_vm1, %v2656_v14  ;;  %v2423_v43 = vpack.c.bf16 %v2034_v42, %v2033_v41  ;;  %v2040_v48 = vld [vmem:[%s3002_s2 + $0x20] sm:$0xff]  ;;  %v2050_v7 = vld [vmem:[%s3003_s3 + $0x38] sm:$0xff]  ;;  %v2057_v23 = vld [vmem:[%s3007_s7 + $0x10] sm:$0xff] }
   0xc   :  { %2213 = vmatmul.mubr.msk.f32.vlgmr.msra.gmra.mrb[0].mxu0 %vm48_vm1, %v2656_v14  ;;  %2239 = vmatprep.mubr.msk.f32.mxu1 %vm2560_vm0, %v2561_v11  ;;  %v2429_v51 = vpack.c.bf16 %v2041_v49, %v2040_v48  ;;  %v2045_v60 = vld [vmem:[%s3005_s5 + $0x1] ss:$0 sm:$0xff]  ;;  %v2438_v8 = vpack.c.bf16 %v2050_v7, %v2049_v5  ;;  %v2058_v24 = vld [vmem:[%s3007_s7 + $0x18] sm:$0xff]  ;;  %v2063_v41 = vld [vmem:[%s3001_s1 + $0x50] sm:$0xff] }
   0xd   :  { %2234 = vmatprep.mubr.msk.f32.mxu0 %vm2560_vm0, %v2561_v11  ;;  %2418 = vmatpush3.bf16.msra.mxu0 %v2417_v26  ;;  %v2038_v61 = vld [vmem:[%s3004_s4 + $0x1] ss:$0 sm:$0xff]  ;;  %v2441_v25 = vpack.c.bf16 %v2058_v24, %v2057_v23  ;;  %v2064_v42 = vld [vmem:[%s3001_s1 + $0x58] sm:$0xff]  ;;  %v2073_v48 = vld [vmem:[%s3005_s5 + $0x2] ss:$0 sm:$0xff] }
   0xe   :  { %2419 = vmatprep.subr.bf16.mxu0 %v2559_v3  ;;  %v2047_v2 = vld [vmem:[%s3003_s3 + $0x20] sm:$0xff]  ;;  %v2450_v45 = vpack.c.bf16 %v2064_v42, %v2063_v41  ;;  %v2089_v23 = vld [vmem:[%s3001_s1 + $0x68] sm:$0xff] }
   0xf   :  { %v2435_v6 = vpack.c.bf16 %v2048_v4, %v2047_v2  ;;  %v447_v27 = vld [vmem:[%s3007_s7] sm:$0xff] }
  0x10   :  { %v2100_v41 = vld [vmem:[%s3005_s5 + $0x3] ss:$0 sm:$0xff] }
  0x11   :  { %2421 = vmatpush3.bf16.msra.mxu0 %v2420_v28  ;;  %v448_v28 = vld [vmem:[%s3007_s7 + $0x8] sm:$0xff]  ;;  %v2093_v42 = vld [vmem:[%s3004_s4 + $0x3] ss:$0 sm:$0xff] }
  0x12   :  { %2422 = vmatprep.subr.bf16.mxu0 %v2559_v3 }
  0x14   :  { %2235 = vmatmul.mubr.msk.f32.vlgmr.msra.gmra.mrb[2].mxu0 %vm48_vm1, %v2656_v14 }
  0x15   :  { %2255 = vmatprep.mubr.msk.f32.mxu0 %vm2560_vm0, %v2561_v11  ;;  %2424 = vmatpush3.bf16.msra.mxu0 %v2423_v43 }
  0x16   :  { %2425 = vmatprep.subr.bf16.mxu0 %v2559_v3 }
  0x19   :  { %2427 = vmatpush3.bf16.msra.mxu0 %v2426_v46 }
  0x1a   :  { %2434 = vmatprep.subr.bf16.mxu0 %v2559_v3 }
  0x1c   :  { %2256 = vmatmul.mubr.msk.f32.vlgmr.msra.gmra.mrb[4].mxu0 %vm48_vm1, %v2656_v14 }
  0x1d   :  { %2277 = vmatprep.mubr.msk.f32.mxu0 %vm2560_vm0, %v2561_v11  ;;  %2436 = vmatpush3.bf16.msra.mxu0 %v2435_v6 }
  0x1e   :  { %2437 = vmatprep.subr.bf16.mxu0 %v2559_v3 }
  0x21   :  { %2439 = vmatpush3.bf16.msra.mxu0 %v2438_v8 }
  0x22   :  { %2440 = vmatprep.subr.bf16.mxu0 %v2559_v3 }
  0x24   :  { %2278 = vmatmul.mubr.msk.f32.vlgmr.msra.gmra.mrb[6].mxu0 %vm48_vm1, %v2656_v14 }
  0x25   :  { %2294 = vmatprep.mubr.msk.f32.mxu0 %vm2560_vm0, %v2561_v11  ;;  %2442 = vmatpush3.bf16.msra.mxu0 %v2441_v25  ;;  %v2090_v25 = vld [vmem:[%s3001_s1 + $0x70] sm:$0xff] }
  0x26   :  { %2446 = vmatprep.subr.bf16.mxu0 %v2559_v3 }
  0xde   :  { %v199_v17 = vpop.f32.mrb[0].mxu1 }
  0xdf   :  { %v200_v18 = vadd.f32 %v2026_v15, %v199_v17  ;;  %v2225_v19 = vpop.f32.mrb[1].mxu1  ;;  %v118_v20 = vpop.f32.mrb[0].mxu0 }
  0xe0   :  { %v119_v21 = vadd.f32 %v2024_v16, %v118_v20  ;;  %v2214_v22 = vpop.f32.mrb[1].mxu0  ;;  %v2052_v20 = vld [vmem:[%s3006_s6 + $0x1] ss:$0 sm:$0xff] }
  0xe1   :  { %2238 = vmatpush3.xpose.msk.msra.mxu1 %vm284_vm2, %v200_v18 }
  0xe2   :  { %2242 = vmatprep.subr.mxu1 %v2561_v11 }
  0xe4   :  { %2240 = vmatmul.mubr.msk.f32.vlgmr.msra.gmra.mrb[2].mxu1 %vm284_vm2, %v119_v21 }
  0xe5   :  { %2244 = vmatprep.mubr.msk.f32.mxu1 %vm2560_vm0, %v2561_v11 }
  0xe7   :  { %v280_v37 = vpop.f32.mrb[2].mxu0 }
  0xe8   :  { %v2236_v39 = vpop.f32.mrb[3].mxu0  ;;  %v281_v40 = vadd.f32 %v2028_v38, %v280_v37  ;;  %v2061_v38 = vld [vmem:[%s3001_s1 + $0x40] sm:$0xff] }
  0xe9   :  { %v2062_v39 = vld [vmem:[%s3001_s1 + $0x48] sm:$0xff] }
  0xea   :  { %2243 = vmatpush3.msra.mxu1 %v281_v40  ;;  %v2447_v40 = vpack.c.bf16 %v2062_v39, %v2061_v38 }
  0xeb   :  { %2428 = vmatprep.subr.bf16.mxu1 %v2559_v3 }
  0xef   :  { %v528_v56 = vpop.f32.mrb[4].mxu0 }
  0xf0   :  { %v2257_v57 = vpop.f32.mrb[5].mxu0  ;;  %v529_v1 = vadd.f32 %v2038_v61, %v528_v56  ;;  %v2077_v61 = vld [vmem:[%s3003_s3 + $0x50] sm:$0xff] }
  0xf7   :  { %v694_v19 = vpop.f32.mrb[6].mxu0 }
  0xf8   :  { %v2279_v21 = vpop.f32.mrb[7].mxu0  ;;  %v695_v22 = vadd.f32 %v2052_v20, %v694_v19 }
 0x1b7   :  { %v357_v29 = vpop.f32.mrb[2].mxu1 }
 0x1b8   :  { %v2241_v30 = vpop.f32.mrb[3].mxu1  ;;  %v362_v31 = vsel %vm361_vm3, %v357_v29, -inf }
 0x1b9   :  { %363 = vmax.xlane.f32.xlu0 %v362_v31  ;;  %v2444_v30 = vpack.c.bf16 %v448_v28, %v447_v27  ;;  %v2095_v28 = vld [vmem:[%s3002_s2 + $0x60] sm:$0xff] }
 0x246   :  { %v364_v32 = vpop.xlane.xlu0 %363 }
 0x247   :  { %v365_v33 = vsub.f32 %v357_v29, %v364_v32  ;;  %v2068_v32 = vld [vmem:[%s3002_s2 + $0x40] sm:$0xff] }
 0x249   :  { %v366_v34 = vmul.f32 1.442695, %v365_v33  ;;  %v2069_v33 = vld [vmem:[%s3002_s2 + $0x48] sm:$0xff] }
 0x24b   :  { %2495 = vpow2.f32 %v366_v34  ;;  %v2453_v34 = vpack.c.bf16 %v2069_v33, %v2068_v32  ;;  %v2098_v32 = vld [vmem:[%s3002_s2 + $0x78] sm:$0xff] }
 0x255   :  { %v2496_v35 = vpop.eup %2495 }
 0x256   :  { %v368_v36 = vsel %vm361_vm3, %v2496_v35, 0.0 }
 0x257   :  { %369 = vadd.xlane.f32.xlu0 %v368_v36  ;;  %v2071_v36 = vld [vmem:[%s3002_s2 + $0x58] sm:$0xff] }
 0x2e4   :  { %v370_v47 = vpop.xlane.xlu0 %369 }
 0x2e5   :  { %2497 = vrcp.f32 %v370_v47 }
 0x2ef   :  { %v2498_v50 = vpop.eup %2497 }
 0x2f0   :  { %v372_v52 = vmul.f32 %v2498_v50, %v2496_v35  ;;  %v2070_v35 = vld [vmem:[%s3002_s2 + $0x50] sm:$0xff] }
 0x2f1   :  { %v2456_v37 = vpack.c.bf16 %v2071_v36, %v2070_v35 }
 0x2f2   :  { %373 = vst.msk [vmem:[#allocation2] sm:$0xff] %vm361_vm3, %v372_v52  ;;  %2245 = vmatmul.mubr.msk.f32.vlgmr.msra.gmra.mrb[4].mxu1 %vm361_vm3, %v372_v52 }
 0x2f3   :  { %2430 = vmatpush3.bf16.msra.mxu1 %v2429_v51  ;;  %2266 = vmatprep.mubr.msk.f32.mxu1 %vm2560_vm0, %v2561_v11 }
 0x2f4   :  { %2431 = vmatprep.subr.bf16.mxu1 %v2559_v3 }
 0x2f7   :  { %2433 = vmatpush3.bf16.msra.mxu1 %v2432_v55  ;;  %v2066_v55 = vld [vmem:[%s3004_s4 + $0x2] ss:$0 sm:$0xff] }
 0x2f8   :  { %2280 = vmatprep.subr.mxu1 %v2561_v11 }
 0x2fa   :  { %2267 = vmatmul.mubr.msk.f32.vlgmr.msra.gmra.mrb[6].mxu1 %vm48_vm1, %v2656_v14 }
 0x2fb   :  { %2282 = vmatprep.mubr.msk.f32.mxu1 %vm2560_vm0, %v2561_v11 }
 0x3c5   :  { %v443_v58 = vpop.f32.mrb[4].mxu1 }
 0x3c6   :  { %v2246_v59 = vpop.f32.mrb[5].mxu1 }
 0x3c7   :  { %v2075_v59 = vld [vmem:[%s3003_s3 + $0x40] sm:$0xff] }
 0x3cd   :  { %v611_v62 = vpop.f32.mrb[6].mxu1 }
 0x3ce   :  { %v612_v63 = vadd.f32 %v2045_v60, %v611_v62  ;;  %v2268_v0 = vpop.f32.mrb[7].mxu1  ;;  %v2076_v60 = vld [vmem:[%s3003_s3 + $0x48] sm:$0xff] }
 0x3cf   :  { %v2459_v62 = vpack.c.bf16 %v2076_v60, %v2075_v59 }
 0x3d0   :  { %2281 = vmatpush3.xpose.msk.msra.mxu1 %vm284_vm2, %v612_v63  ;;  %v2078_v63 = vld [vmem:[%s3003_s3 + $0x58] sm:$0xff] }
 0x3d1   :  { %2285 = vmatprep.subr.mxu1 %v2561_v11  ;;  %v2462_v0 = vpack.c.bf16 %v2078_v63, %v2077_v61  ;;  %v2113_v63 = vld [vmem:[%s3007_s7 + $0x38] sm:$0xff] }
 0x3d3   :  { %2283 = vmatmul.mubr.msk.f32.vlgmr.msra.gmra.mrb[8].mxu1 %vm284_vm2, %v529_v1 }
 0x3d4   :  { %2287 = vmatprep.mubr.msk.f32.mxu1 %vm2560_vm0, %v2561_v11  ;;  %2286 = vmatpush3.msra.mxu1 %v695_v22  ;;  %v2088_v22 = vld [vmem:[%s3001_s1 + $0x60] sm:$0xff] }
 0x3d5   :  { %2443 = vmatprep.subr.bf16.mxu1 %v2559_v3  ;;  %v2468_v24 = vpack.c.bf16 %v2089_v23, %v2088_v22 }
 0x4a6   :  { %v770_v9 = vpop.f32.mrb[8].mxu1 }
 0x4a7   :  { %v2284_v10 = vpop.f32.mrb[9].mxu1  ;;  %v774_v12 = vsel %vm361_vm3, %v770_v9, -inf }
 0x4a8   :  { %775 = vmax.xlane.f32.xlu1 %v774_v12  ;;  %v2080_v12 = vld [vmem:[%s3006_s6 + $0x2] ss:$0 sm:$0xff] }
 0x535   :  { %v776_v13 = vpop.xlane.xlu1 %775 }
 0x536   :  { %v777_v15 = vsub.f32 %v770_v9, %v776_v13 }
 0x538   :  { %v778_v16 = vmul.f32 1.442695, %v777_v15 }
 0x53a   :  { %2499 = vpow2.f32 %v778_v16  ;;  %v2085_v16 = vld [vmem:[%s3007_s7 + $0x20] sm:$0xff] }
 0x544   :  { %v2500_v17 = vpop.eup %2499 }
 0x545   :  { %v780_v18 = vsel %vm361_vm3, %v2500_v17, 0.0 }
 0x546   :  { %781 = vadd.xlane.f32.xlu1 %v780_v18 }
 0x5d3   :  { %v782_v26 = vpop.xlane.xlu1 %781 }
 0x5d4   :  { %2501 = vrcp.f32 %v782_v26  ;;  %v2091_v26 = vld [vmem:[%s3001_s1 + $0x78] sm:$0xff] }
 0x5d5   :  { %v2471_v27 = vpack.c.bf16 %v2091_v26, %v2090_v25 }
 0x5de   :  { %v2502_v29 = vpop.eup %2501 }
 0x5df   :  { %v784_v31 = vmul.f32 %v2502_v29, %v2500_v17  ;;  %v2086_v17 = vld [vmem:[%s3007_s7 + $0x28] sm:$0xff] }
 0x5e0   :  { %v2465_v18 = vpack.c.bf16 %v2086_v17, %v2085_v16  ;;  %v2096_v29 = vld [vmem:[%s3002_s2 + $0x68] sm:$0xff] }
 0x5e1   :  { %786 = vst.msk [vmem:[#allocation2 + $0x8] sm:$0xff] %vm361_vm3, %v784_v31  ;;  %2288 = vmatmul.mubr.msk.f32.vlgmr.msra.gmra.mrb[10].mxu1 %vm361_vm3, %v784_v31  ;;  %v2097_v31 = vld [vmem:[%s3002_s2 + $0x70] sm:$0xff] }
 0x5e2   :  { %2445 = vmatpush3.bf16.msra.mxu1 %v2444_v30  ;;  %2301 = vmatprep.mubr.msk.f32.mxu1 %vm2560_vm0, %v2561_v11  ;;  %v2474_v30 = vpack.c.bf16 %v2096_v29, %v2095_v28  ;;  %v2477_v35 = vpack.c.bf16 %v2098_v32, %v2097_v31 }
 0x5e3   :  { %2452 = vmatprep.subr.bf16.mxu1 %v2559_v3 }
 0x5e5   :  { %2302 = vmatmul.mubr.msk.f32.vlgmr.msra.gmra.mrb[12].mxu1 %vm284_vm2, %v443_v58 }
 0x5e6   :  { %2454 = vmatpush3.bf16.msra.mxu1 %v2453_v34  ;;  %2323 = vmatprep.mubr.msk.f32.mxu1 %vm2560_vm0, %v2561_v11 }
 0x5e7   :  { %2455 = vmatprep.subr.bf16.mxu1 %v2559_v3 }
 0x5ea   :  { %2457 = vmatpush3.bf16.msra.mxu1 %v2456_v37 }
 0x5eb   :  { %2337 = vmatprep.subr.mxu1 %v2561_v11 }
 0x5ed   :  { %2324 = vmatmul.mubr.msk.f32.vlgmr.msra.gmra.mrb[14].mxu1 %vm48_vm1, %v2656_v14 }
 0x5ee   :  { %2339 = vmatprep.mubr.msk.f32.mxu1 %vm2560_vm0, %v2561_v11 }
 0x6b4   :  { %v856_v43 = vpop.f32.mrb[10].mxu1 }
 0x6b5   :  { %v2289_v44 = vpop.f32.mrb[11].mxu1  ;;  %2295 = vmatmul.mubr.msk.f32.vlgmr.msra.gmra.mrb[8].mxu0 %vm284_vm2, %v856_v43 }
 0x6b6   :  { %2448 = vmatpush3.bf16.msra.mxu0 %v2447_v40  ;;  %2312 = vmatprep.mubr.msk.f32.mxu0 %vm2560_vm0, %v2561_v11 }
 0x6b7   :  { %2449 = vmatprep.subr.bf16.mxu0 %v2559_v3 }
 0x6b8   :  { %v1005_v46 = vpop.f32.mrb[12].mxu1 }
 0x6b9   :  { %v2303_v47 = vpop.f32.mrb[13].mxu1 }
 0x6ba   :  { %2451 = vmatpush3.bf16.msra.mxu0 %v2450_v45  ;;  %v2102_v47 = vld [vmem:[%s3003_s3 + $0x60] sm:$0xff] }
 0x6bb   :  { %2458 = vmatprep.subr.bf16.mxu0 %v2559_v3 }
 0x6bd   :  { %2313 = vmatmul.mubr.msk.f32.vlgmr.msra.gmra.mrb[10].mxu0 %vm48_vm1, %v2656_v14 }
 0x6be   :  { %2334 = vmatprep.mubr.msk.f32.mxu0 %vm2560_vm0, %v2561_v11  ;;  %2460 = vmatpush3.bf16.msra.mxu0 %v2459_v62  ;;  %v2112_v62 = vld [vmem:[%s3007_s7 + $0x30] sm:$0xff] }
 0x6bf   :  { %2461 = vmatprep.subr.bf16.mxu0 %v2559_v3 }
 0x6c0   :  { %v1171_v49 = vpop.f32.mrb[14].mxu1 }
 0x6c1   :  { %v1172_v50 = vadd.f32 %v2073_v48, %v1171_v49  ;;  %v2325_v51 = vpop.f32.mrb[15].mxu1  ;;  %v2103_v48 = vld [vmem:[%s3003_s3 + $0x68] sm:$0xff]  ;;  %v2104_v49 = vld [vmem:[%s3003_s3 + $0x70] sm:$0xff] }
 0x6c2   :  { %2463 = vmatpush3.bf16.msra.mxu0 %v2462_v0  ;;  %v2105_v51 = vld [vmem:[%s3003_s3 + $0x78] sm:$0xff]  ;;  %v2486_v0 = vpack.c.bf16 %v2113_v63, %v2112_v62 }
 0x6c3   :  { %2338 = vmatpush3.xpose.msk.msra.mxu1 %vm284_vm2, %v1172_v50  ;;  %2464 = vmatprep.subr.bf16.mxu0 %v2559_v3  ;;  %v2480_v50 = vpack.c.bf16 %v2103_v48, %v2102_v47 }
 0x6c4   :  { %2342 = vmatprep.subr.mxu1 %v2561_v11 }
 0x6c5   :  { %2335 = vmatmul.mubr.msk.f32.vlgmr.msra.gmra.mrb[12].mxu0 %vm48_vm1, %v2656_v14 }
 0x6c6   :  { %2351 = vmatprep.mubr.msk.f32.mxu0 %vm2560_vm0, %v2561_v11  ;;  %2466 = vmatpush3.bf16.msra.mxu0 %v2465_v18 }
 0x6c7   :  { %2473 = vmatprep.subr.bf16.mxu0 %v2559_v3 }
 0x788   :  { %v932_v52 = vpop.f32.mrb[8].mxu0 }
 0x789   :  { %v2843_v53 = vadd.f32 %v1005_v46, %v932_v52  ;;  %v2296_v54 = vpop.f32.mrb[9].mxu0  ;;  %v2483_v52 = vpack.c.bf16 %v2105_v51, %v2104_v49 }
 0x790   :  { %v1088_v56 = vpop.f32.mrb[10].mxu0 }
 0x791   :  { %v1089_v57 = vadd.f32 %v2066_v55, %v1088_v56  ;;  %v2314_v58 = vpop.f32.mrb[11].mxu0 }
 0x793   :  { %2340 = vmatmul.mubr.msk.f32.vlgmr.msra.gmra.mrb[16].mxu1 %vm284_vm2, %v1089_v57 }
 0x794   :  { %2344 = vmatprep.mubr.msk.f32.mxu1 %vm2560_vm0, %v2561_v11 }
 0x798   :  { %v1254_v10 = vpop.f32.mrb[12].mxu0 }
 0x799   :  { %v2336_v13 = vpop.f32.mrb[13].mxu0  ;;  %v1255_v15 = vadd.f32 %v2080_v12, %v1254_v10 }
 0x79b   :  { %2343 = vmatpush3.msra.mxu1 %v1255_v15 }
 0x79c   :  { %2467 = vmatprep.subr.bf16.mxu1 %v2559_v3 }
 0x866   :  { %v1330_v1 = vpop.f32.mrb[16].mxu1 }
 0x867   :  { %v2341_v2 = vpop.f32.mrb[17].mxu1  ;;  %v1334_v4 = vsel %vm361_vm3, %v1330_v1, -inf }
 0x868   :  { %1335 = vmax.xlane.f32.xlu0 %v1334_v4 }
 0x8f5   :  { %v1336_v5 = vpop.xlane.xlu0 %1335 }
 0x8f6   :  { %v1337_v6 = vsub.f32 %v1330_v1, %v1336_v5 }
 0x8f8   :  { %v1338_v7 = vmul.f32 1.442695, %v1337_v6 }
 0x8fa   :  { %2503 = vpow2.f32 %v1338_v7 }
 0x904   :  { %v2504_v8 = vpop.eup %2503 }
 0x905   :  { %v1340_v9 = vsel %vm361_vm3, %v2504_v8, 0.0 }
 0x906   :  { %1341 = vadd.xlane.f32.xlu1 %v1340_v9 }
 0x993   :  { %v1342_v19 = vpop.xlane.xlu1 %1341 }
 0x994   :  { %2505 = vrcp.f32 %v1342_v19 }
 0x99e   :  { %v2506_v20 = vpop.eup %2505 }
 0x99f   :  { %v1344_v21 = vmul.f32 %v2506_v20, %v2504_v8 }
 0x9a1   :  { %1346 = vst.msk [vmem:[#allocation2 + $0x10] sm:$0xff] %vm361_vm3, %v1344_v21  ;;  %2345 = vmatmul.mubr.msk.f32.vlgmr.msra.gmra.mrb[18].mxu1 %vm361_vm3, %v1344_v21 }
 0x9a2   :  { %2362 = vmatprep.mubr.msk.f32.mxu1 %vm2560_vm0, %v2561_v11  ;;  %2469 = vmatpush3.bf16.msra.mxu1 %v2468_v24 }
 0x9a3   :  { %2470 = vmatprep.subr.bf16.mxu1 %v2559_v3 }
 0x9a6   :  { %2472 = vmatpush3.bf16.msra.mxu1 %v2471_v27 }
 0x9a7   :  { %2479 = vmatprep.subr.bf16.mxu1 %v2559_v3 }
 0x9a9   :  { %2363 = vmatmul.mubr.msk.f32.vlgmr.msra.gmra.mrb[20].mxu1 %vm48_vm1, %v2656_v14 }
 0x9aa   :  { %2384 = vmatprep.mubr.msk.f32.mxu1 %vm2560_vm0, %v2561_v11  ;;  %2481 = vmatpush3.bf16.msra.mxu1 %v2480_v50 }
 0x9ab   :  { %2482 = vmatprep.subr.bf16.mxu1 %v2559_v3 }
 0x9ae   :  { %2484 = vmatpush3.bf16.msra.mxu1 %v2483_v52 }
 0x9af   :  { %2485 = vmatprep.subr.bf16.mxu1 %v2559_v3 }
 0x9b1   :  { %2385 = vmatmul.mubr.msk.f32.vlgmr.msra.gmra.mrb[22].mxu1 %vm48_vm1, %v2656_v14 }
 0x9b2   :  { %2401 = vmatprep.mubr.msk.f32.mxu1 %vm2560_vm0, %v2561_v11  ;;  %2487 = vmatpush3.bf16.msra.mxu1 %v2486_v0 }
 0xa74   :  { %v1416_v33 = vpop.f32.mrb[18].mxu1 }
 0xa75   :  { %v2346_v34 = vpop.f32.mrb[19].mxu1  ;;  %2352 = vmatmul.mubr.msk.f32.vlgmr.msra.gmra.mrb[14].mxu0 %vm284_vm2, %v1416_v33 }
 0xa76   :  { %2475 = vmatpush3.bf16.msra.mxu0 %v2474_v30  ;;  %2373 = vmatprep.mubr.msk.f32.mxu0 %vm2560_vm0, %v2561_v11 }
 0xa77   :  { %2476 = vmatprep.subr.bf16.mxu0 %v2559_v3 }
 0xa7a   :  { %2478 = vmatpush3.bf16.msra.mxu0 %v2477_v35 }
 0xa7b   :  { %2387 = vmatprep.subr.mxu0 %v2561_v11 }
 0xa7c   :  { %v1576_v36 = vpop.f32.mrb[20].mxu1 }
 0xa7d   :  { %2374 = vmatmul.mubr.msk.f32.vlgmr.msra.gmra.mrb[16].mxu0 %vm48_vm1, %v2656_v14  ;;  %v2364_v37 = vpop.f32.mrb[21].mxu1  ;;  %v1577_v46 = vadd.f32 %v2093_v42, %v1576_v36  ;;  %v2107_v14 = vld [vmem:[%s3006_s6 + $0x3] ss:$0 sm:$0xff]  ;;  %s2562_s6 = smov [#allocation2]  }
 0xa7e   :  { %2389 = vmatprep.mubr.msk.f32.mxu0 %vm2560_vm0, %v2561_v11  ;;  %s1999_s20 = sshll.u32 %s2562_s6, 4  ;;  %s2000_s20 = int_to_ptr.vmem [resolvable:$true] %s1999_s20 }
 0xa7f   :  { %s2511_s21 = scalar_lea.vmem %s2000_s20, 512  ;;  %p2516_p1 = scmp.lt.s32.totalorder %s2000_s20, %s2000_s20 }
 0xa80   :  { %p2512_p0 = scmp.ne.s32.totalorder %s2000_s20, %s2511_s21  ;;  %p2517_p2 = scmp.lt.s32.totalorder %s2511_s21, %s2511_s21 }
 0xa82   :  { %p2518_p3 = por %p2517_p2, %p2516_p1 }
 0xa84   :  { %v1742_v3 = vpop.f32.mrb[22].mxu1  ;;  %p2519_p4 = pnand %p2518_p3, %p2512_p0 }
 0xa85   :  { %v2386_v61 = vpop.f32.mrb[23].mxu1 }
 0xb48   :  { %v1492_v38 = vpop.f32.mrb[14].mxu0 }
 0xb49   :  { %v2926_v39 = vadd.f32 %v1492_v38, %v2843_v53  ;;  %v2353_v40 = vpop.f32.mrb[15].mxu0 }
 0xb50   :  { %v1659_v43 = vpop.f32.mrb[16].mxu0 }
 0xb51   :  { %v1660_v44 = vadd.f32 %v2100_v41, %v1659_v43  ;;  %v2375_v45 = vpop.f32.mrb[17].mxu0 }
 0xb53   :  { %2388 = vmatpush3.xpose.msk.msra.mxu0 %vm284_vm2, %v1660_v44 }
 0xb54   :  { %2392 = vmatprep.subr.mxu0 %v2561_v11 }
 0xb56   :  { %2390 = vmatmul.mubr.msk.f32.vlgmr.msra.gmra.mrb[18].mxu0 %vm284_vm2, %v1577_v46 }
 0xb57   :  { %2394 = vmatprep.mubr.msk.f32.mxu0 %vm2560_vm0, %v2561_v11  ;;  %v1743_v11 = vadd.f32 %v2107_v14, %v1742_v3 }
 0xb59   :  { %2393 = vmatpush3.msra.mxu0 %v1743_v11 }
 0xc29   :  { %v1818_v53 = vpop.f32.mrb[18].mxu0 }
 0xc2a   :  { %v2391_v54 = vpop.f32.mrb[19].mxu0  ;;  %v1822_v55 = vsel %vm361_vm3, %v1818_v53, -inf }
 0xc2b   :  { %1823 = vmax.xlane.f32.xlu0 %v1822_v55 }
 0xcb8   :  { %v1824_v56 = vpop.xlane.xlu0 %1823 }
 0xcb9   :  { %v1825_v57 = vsub.f32 %v1818_v53, %v1824_v56 }
 0xcbb   :  { %v1826_v58 = vmul.f32 1.442695, %v1825_v57 }
 0xcbd   :  { %2507 = vpow2.f32 %v1826_v58 }
 0xcc7   :  { %v2508_v59 = vpop.eup %2507 }
 0xcc8   :  { %v1828_v60 = vsel %vm361_vm3, %v2508_v59, 0.0 }
 0xcc9   :  { %1829 = vadd.xlane.f32.xlu1 %v1828_v60 }
 0xd56   :  { %v1830_v1 = vpop.xlane.xlu1 %1829 }
 0xd57   :  { %2509 = vrcp.f32 %v1830_v1 }
 0xd61   :  { %v2510_v2 = vpop.eup %2509 }
 0xd62   :  { %v1832_v4 = vmul.f32 %v2510_v2, %v2508_v59 }
 0xd64   :  { %1834 = vst.msk [vmem:[#allocation2 + $0x18] sm:$0xff] %vm361_vm3, %v1832_v4  ;;  %2395 = vmatmul.mubr.msk.f32.vlgmr.msra.gmra.mrb[20].mxu0 %vm361_vm3, %v1832_v4 }
 0xe37   :  { %v1904_v5 = vpop.f32.mrb[20].mxu0 }
 0xe38   :  { %v2396_v6 = vpop.f32.mrb[21].mxu0  ;;  %2402 = vmatmul.mubr.msk.f32.vlgmr.msra.gmra.mrb[24].mxu1 %vm284_vm2, %v1904_v5 }
 0xe39   :  { %2522 = shalt.err (!%p2519_p4)
}
 0xe3a   :  { %s2523_s23 = scalar_lea.hbm %s3009_s9, 512 }
 0xe3b   :  { %p2524_p5 = scmp.ne.s32.totalorder %s3009_s9, %s2523_s23  ;;  %p2527_p6 = scmp.lt.u32.totalorder %s2523_s23, %s3009_s9 }
 0xe3d   :  { %p2529_p7 = pnand %p2527_p6, %p2524_p5 }
 0xe3f   :  { %2532 = shalt.err (!%p2529_p7)
}
 0xe40   :  { %s2563_s2 = smov 128   ;;  %s2564_s27 = smov 8   ;;  %v2115_v8 = vld [vmem:[%s3008_s8] ss:$0 sm:$0xff] }
 0xe41   :  { %2005 = dma.vmem_to_hbm [thread:$0]  %s2000_s20, 512, %s3009_s9, [#allocation3], %s2563_s2, %s2563_s2, %s2564_s27  }
 0xe42   :  { %s2565_s5 = smov [#allocation4]  }
 0xe43   :  { %s2012_s11 = sshll.u32 %s2565_s5, 4  ;;  %s2013_s11 = int_to_ptr.vmem [resolvable:$true] %s2012_s11 }
 0xe44   :  { %s2533_s4 = scalar_lea.vmem %s2013_s11, 128  ;;  %p2538_p9 = scmp.lt.s32.totalorder %s2013_s11, %s2013_s11 }
 0xe45   :  { %p2534_p8 = scmp.ne.s32.totalorder %s2013_s11, %s2533_s4  ;;  %p2539_p10 = scmp.lt.s32.totalorder %s2533_s4, %s2533_s4 }
 0xe47   :  { %p2540_p11 = por %p2539_p10, %p2538_p9 }
 0xe49   :  { %p2541_p12 = pnand %p2540_p11, %p2534_p8 }
 0xf0b   :  { %v1980_v7 = vpop.f32.mrb[24].mxu1 }
 0xf0c   :  { %v1984_v9 = vadd.f32 %v1980_v7, %v2926_v39  ;;  %v2403_v10 = vpop.f32.mrb[25].mxu1 }
 0xf0e   :  { %v1992_v12 = vadd.f32 %v2115_v8, %v1984_v9 }
 0xf10   :  { %1993 = vst.msk [vmem:[#allocation4] sm:$0xff] %vm284_vm2, %v1992_v12 }
 0xf11   :  { %2544 = shalt.err (!%p2541_p12)
}
 0xf12   :  { %s2545_s8 = scalar_lea.hbm %s3010_s10, 128 }
 0xf13   :  { %p2546_p13 = scmp.ne.s32.totalorder %s3010_s10, %s2545_s8  ;;  %p2549_p0 = scmp.lt.u32.totalorder %s2545_s8, %s3010_s10 }
 0xf15   :  { %p2551_p1 = pnand %p2549_p0, %p2546_p13 }
 0xf17   :  { %2554 = shalt.err (!%p2551_p1)
}
 0xf18   :  { %2015 = dma.vmem_to_hbm [thread:$0]  %s2013_s11, 128, %s3010_s10, [#allocation5]  }
 0xf19   :  { %2555 = dma.done.wait [#allocation3], 512  }
 0xf1a   :  { %2556 = vsyncadd [#allocation3], 4294966784 }
 0xf1b   :  { %2557 = dma.done.wait [#allocation5], 128  }
 0xf1c   :  { %2558 = vsyncadd [#allocation5], 4294967168 }
 0xf1d   :  { %2022 = vsyncpa [#allocation3], 1 }
 0xf1e   :  { %2023 = vsyncpa [#allocation5], 1 }

</bundles_post_ra>
